<compile_context>
chip_gen: v6e
topology: v6e:2x2x1
jax: 0.10.0
libtpu: 0.0.40
codegen_flags: <defaults>
</compile_context>

<pallas_src>
import jax
import jax.numpy as jnp
from jax.experimental import pallas as pl
from jax.experimental.pallas import tpu as pltpu

_LANE = 128  # pad Cout to this so output stores are lane-dense


def _round_up(x, m):
    return (x + m - 1) // m * m


def _pick_tm(m):
    """Pick the M tile: big enough to hide per-step overhead, 16-aligned."""
    m16 = _round_up(m, 16)
    for tm in (512, 256, 128):
        if m16 >= tm:
            return tm
    return m16


def _matmul_bias_relu_kernel(a_ref, b_ref, bias_ref, o_ref):
    # a_ref: (TM, K) bf16 patches, b_ref: (K, 128) bf16 weights,
    # bias_ref: (1, 128) f32, o_ref: (TM, 128) f32.
    acc = jnp.dot(a_ref[...], b_ref[...], preferred_element_type=jnp.float32)
    o_ref[...] = jnp.maximum(acc + bias_ref[...], 0.0)


def _im2col_nhwc(x, kh, kw, stride):
    """x: (N, H, W, C) -> (N*oh*ow, kh*kw*C) with column order (kh, kw, cin)."""
    n, h, w, c = x.shape
    oh = (h - kh) // stride + 1
    ow = (w - kw) // stride + 1
    cols = []
    for i in range(kh):
        for j in range(kw):
            cols.append(
                x[:, i:i + stride * oh:stride, j:j + stride * ow:stride, :])
    patches = jnp.stack(cols, axis=3)            # (N, oh, ow, kh*kw, C)
    return patches.reshape(n * oh * ow, kh * kw * c), oh, ow


def conv2d_relu_pallas(x_nhwc, w_mat, bias_row, kh, kw, stride, cout):
    """Conv2d (valid) + ReLU, NHWC in / NHWC out.

    x_nhwc: (N, H, W, Cin) f32
    w_mat:  (kh*kw*Cin, 128) bf16  (Cout zero-padded to 128, (kh,kw,cin) rows)
    bias_row: (1, 128) f32 (zero-padded)
    Returns (N, OH, OW, Cout) f32.
    """
    n = x_nhwc.shape[0]
    a, oh, ow = _im2col_nhwc(x_nhwc, kh, kw, stride)   # (M, K)
    m, k = a.shape
    tm = _pick_tm(m)
    m_pad = _round_up(m, tm)

    a = a.astype(jnp.bfloat16)
    if m_pad != m:
        a = jnp.pad(a, ((0, m_pad - m), (0, 0)))

    cout_pad = w_mat.shape[1]                          # 128

    out = pl.pallas_call(
        _matmul_bias_relu_kernel,
        out_shape=jax.ShapeDtypeStruct((m_pad, cout_pad), jnp.float32),
        grid=(m_pad // tm,),
        in_specs=[
            pl.BlockSpec((tm, k), lambda i: (i, 0)),          # A tile (pipelined)
            pl.BlockSpec((k, cout_pad), lambda i: (0, 0)),    # weights (resident)
            pl.BlockSpec((1, cout_pad), lambda i: (0, 0)),    # bias (resident)
        ],
        out_specs=pl.BlockSpec((tm, cout_pad), lambda i: (i, 0)),
        compiler_params=pltpu.CompilerParams(
            dimension_semantics=("parallel",),       # megacore-shardable on v7x
            vmem_limit_bytes=32 * 1024 * 1024,
        ),
    )(a, w_mat, bias_row)

    out = out[:m, :cout]                              # drop M / lane padding
    return out.reshape(n, oh, ow, cout)


def init_params(key, c_in):
    """Deterministic NatureCNN conv-stack parameters (PyTorch OIHW shapes)."""
    shapes = [
        ((32, c_in, 8, 8), (32,)),
        ((64, 32, 4, 4), (64,)),
        ((64, 64, 3, 3), (64,)),
    ]
    params = []
    for (wshape, bshape) in shapes:
        key, kw_, kb_ = jax.random.split(key, 3)
        fan_in = wshape[1] * wshape[2] * wshape[3]
        bound = 1.0 / jnp.sqrt(fan_in)
        w = jax.random.uniform(kw_, wshape, jnp.float32, -bound, bound)
        b = jax.random.uniform(kb_, bshape, jnp.float32, -bound, bound)
        params.append((w, b))
    return params


def prepare_params(params):
    """Hoisted once: OIHW -> (kh*kw*cin, Cout_pad) bf16 matrix + padded bias."""
    prepared = []
    for w, b in params:
        cout, cin, kh, kw = w.shape
        # Rows ordered (kh, kw, cin) to match _im2col_nhwc column order.
        w_mat = w.transpose(2, 3, 1, 0).reshape(kh * kw * cin, cout)
        cout_pad = _round_up(cout, _LANE)
        w_mat = jnp.pad(w_mat, ((0, 0), (0, cout_pad - cout))).astype(jnp.bfloat16)
        bias_row = jnp.pad(b, (0, cout_pad - cout)).reshape(1, cout_pad)
        bias_row = bias_row.astype(jnp.float32)
        prepared.append((w_mat, bias_row, kh, kw, cout))
    return prepared


def cnn_only_forward(x_nchw, prepared_params):
    """CNNOnly.forward: conv/relu x3 then flatten (PyTorch NCHW semantics)."""
    strides = (4, 2, 1)
    h = x_nchw.transpose(0, 2, 3, 1)                  # NCHW -> NHWC once
    for (w_mat, bias_row, kh, kw, cout), s in zip(prepared_params, strides):
        h = conv2d_relu_pallas(h, w_mat, bias_row, kh, kw, s, cout)
    # Back to NCHW before flatten so the C*H*W order matches nn.Flatten.
    h = h.transpose(0, 3, 1, 2)
    return h.reshape(h.shape[0], -1)


def _reference_forward(x, params):
    """Pure-JAX reference (lax conv, bf16 inputs / f32 accumulation)."""
    strides = (4, 2, 1)
    h = x
    for (w, b), s in zip(params, strides):
        h = jax.lax.conv_general_dilated(
            h.astype(jnp.bfloat16), w.astype(jnp.bfloat16),
            window_strides=(s, s), padding="VALID",
            dimension_numbers=("NCHW", "OIHW", "NCHW"),
            preferred_element_type=jnp.float32)
        h = jnp.maximum(h + b.reshape(1, -1, 1, 1), 0.0)
    return h.reshape(h.shape[0], -1)


if __name__ == "__main__":
    key = jax.random.PRNGKey(0)
    k_x, k_p = jax.random.split(key)

    # Small input: batch=2, 4 stacked frames, 36x36 spatial
    # (36 -> 8 -> 3 -> 1 through the three convs; flatten -> (2, 64)).
    x = jax.random.uniform(k_x, (2, 4, 36, 36), jnp.float32)
    params = init_params(k_p, c_in=4)
    prepared = prepare_params(params)

    forward = jax.jit(lambda inp: cnn_only_forward(inp, prepared))
    out = jax.block_until_ready(forward(x))

    ref = jax.block_until_ready(_reference_forward(x, params))
    assert out.shape == (2, 64), out.shape
    assert jnp.allclose(out, ref, atol=1e-2, rtol=1e-2), "mismatch vs reference"

    print("KERNEL_OK")
</pallas_src>

<mosaic_0001>
module attributes {stable_mosaic.version = 11 : i64} {
  func.func @_matmul_bias_relu_kernel(%arg0: i32, %arg1: memref<128x256xbf16, #tpu.memory_space<vmem>>, %arg2: memref<256x128xbf16, #tpu.memory_space<vmem>>, %arg3: memref<1x128xf32, #tpu.memory_space<vmem>>, %arg4: memref<128x128xf32, #tpu.memory_space<vmem>>) attributes {dimension_semantics = [#tpu.dimension_semantics<parallel>], iteration_bounds = array<i64: 1>, scalar_prefetch = 0 : i64, scratch_operands = 0 : i64, tpu.core_type = #tpu.core_type<tc>, window_params = [{transform_indices = @transform_0, window_bounds = array<i64: 128, 256>}, {pipeline_mode = #tpu.pipeline_mode<synchronous>, transform_indices = @transform_1, window_bounds = array<i64: 256, 128>}, {pipeline_mode = #tpu.pipeline_mode<synchronous>, transform_indices = @transform_2, window_bounds = array<i64: 1, 128>}, {transform_indices = @transform_3, window_bounds = array<i64: 128, 128>}]} {
    %c0 = arith.constant 0 : index
    %c0_0 = arith.constant 0 : index
    %0 = vector.load %arg1[%c0, %c0_0] : memref<128x256xbf16, #tpu.memory_space<vmem>>, vector<128x256xbf16>
    %c0_1 = arith.constant 0 : index
    %c0_2 = arith.constant 0 : index
    %1 = vector.load %arg2[%c0_1, %c0_2] : memref<256x128xbf16, #tpu.memory_space<vmem>>, vector<256x128xbf16>
    %cst = arith.constant dense<0.000000e+00> : vector<128x128xf32>
    %2 = tpu.matmul %0, %1, %cst {dimension_numbers = #tpu.dot_dimension_numbers<[1], [0], [0], [1], [0, 0, 1, 1], [], []>} : vector<128x256xbf16>, vector<256x128xbf16>, vector<128x128xf32> -> vector<128x128xf32>
    %c0_3 = arith.constant 0 : index
    %c0_4 = arith.constant 0 : index
    %3 = vector.load %arg3[%c0_3, %c0_4] : memref<1x128xf32, #tpu.memory_space<vmem>>, vector<1x128xf32>
    %4 = vector.broadcast %3 : vector<1x128xf32> to vector<128x128xf32>
    %5 = arith.addf %2, %4 : vector<128x128xf32>
    %cst_5 = arith.constant 0.000000e+00 : f32
    %6 = vector.broadcast %cst_5 : f32 to vector<128x128xf32>
    %7 = arith.maximumf %5, %6 : vector<128x128xf32>
    %c0_6 = arith.constant 0 : index
    %c0_7 = arith.constant 0 : index
    %8 = vector.load %arg4[%c0_6, %c0_7] : memref<128x128xf32, #tpu.memory_space<vmem>>, vector<128x128xf32>
    tpu.vector_store %arg4[%c0_6, %c0_7], %7 {strides = array<i32>} : memref<128x128xf32, #tpu.memory_space<vmem>>, vector<128x128xf32>,
    return
  }
  func.func @transform_0(%arg0: i32) -> (i32, i32) {
    %c0_i32 = arith.constant 0 : i32
    %c0_i32_0 = arith.constant 0 : i32
    return %arg0, %c0_i32 : i32, i32
  }
  func.func @transform_1(%arg0: i32) -> (i32, i32) {
    %c0_i32 = arith.constant 0 : i32
    %c0_i32_0 = arith.constant 0 : i32
    %c0_i32_1 = arith.constant 0 : i32
    return %c0_i32, %c0_i32_0 : i32, i32
  }
  func.func @transform_2(%arg0: i32) -> (i32, i32) {
    %c0_i32 = arith.constant 0 : i32
    %c0_i32_0 = arith.constant 0 : i32
    %c0_i32_1 = arith.constant 0 : i32
    return %c0_i32, %c0_i32_0 : i32, i32
  }
  func.func @transform_3(%arg0: i32) -> (i32, i32) {
    %c0_i32 = arith.constant 0 : i32
    %c0_i32_0 = arith.constant 0 : i32
    return %arg0, %c0_i32 : i32, i32
  }
}

module attributes {stable_mosaic.version = 11 : i64} {
  func.func @_matmul_bias_relu_kernel(%arg0: i32, %arg1: memref<32x512xbf16, #tpu.memory_space<vmem>>, %arg2: memref<512x128xbf16, #tpu.memory_space<vmem>>, %arg3: memref<1x128xf32, #tpu.memory_space<vmem>>, %arg4: memref<32x128xf32, #tpu.memory_space<vmem>>) attributes {dimension_semantics = [#tpu.dimension_semantics<parallel>], iteration_bounds = array<i64: 1>, scalar_prefetch = 0 : i64, scratch_operands = 0 : i64, tpu.core_type = #tpu.core_type<tc>, window_params = [{transform_indices = @transform_0, window_bounds = array<i64: 32, 512>}, {pipeline_mode = #tpu.pipeline_mode<synchronous>, transform_indices = @transform_1, window_bounds = array<i64: 512, 128>}, {pipeline_mode = #tpu.pipeline_mode<synchronous>, transform_indices = @transform_2, window_bounds = array<i64: 1, 128>}, {transform_indices = @transform_3, window_bounds = array<i64: 32, 128>}]} {
    %c0 = arith.constant 0 : index
    %c0_0 = arith.constant 0 : index
    %0 = vector.load %arg1[%c0, %c0_0] : memref<32x512xbf16, #tpu.memory_space<vmem>>, vector<32x512xbf16>
    %c0_1 = arith.constant 0 : index
    %c0_2 = arith.constant 0 : index
    %1 = vector.load %arg2[%c0_1, %c0_2] : memref<512x128xbf16, #tpu.memory_space<vmem>>, vector<512x128xbf16>
    %cst = arith.constant dense<0.000000e+00> : vector<32x128xf32>
    %2 = tpu.matmul %0, %1, %cst {dimension_numbers = #tpu.dot_dimension_numbers<[1], [0], [0], [1], [0, 0, 1, 1], [], []>} : vector<32x512xbf16>, vector<512x128xbf16>, vector<32x128xf32> -> vector<32x128xf32>
    %c0_3 = arith.constant 0 : index
    %c0_4 = arith.constant 0 : index
    %3 = vector.load %arg3[%c0_3, %c0_4] : memref<1x128xf32, #tpu.memory_space<vmem>>, vector<1x128xf32>
    %4 = vector.broadcast %3 : vector<1x128xf32> to vector<32x128xf32>
    %5 = arith.addf %2, %4 : vector<32x128xf32>
    %cst_5 = arith.constant 0.000000e+00 : f32
    %6 = vector.broadcast %cst_5 : f32 to vector<32x128xf32>
    %7 = arith.maximumf %5, %6 : vector<32x128xf32>
    %c0_6 = arith.constant 0 : index
    %c0_7 = arith.constant 0 : index
    %8 = vector.load %arg4[%c0_6, %c0_7] : memref<32x128xf32, #tpu.memory_space<vmem>>, vector<32x128xf32>
    tpu.vector_store %arg4[%c0_6, %c0_7], %7 {strides = array<i32>} : memref<32x128xf32, #tpu.memory_space<vmem>>, vector<32x128xf32>,
    return
  }
  func.func @transform_0(%arg0: i32) -> (i32, i32) {
    %c0_i32 = arith.constant 0 : i32
    %c0_i32_0 = arith.constant 0 : i32
    return %arg0, %c0_i32 : i32, i32
  }
  func.func @transform_1(%arg0: i32) -> (i32, i32) {
    %c0_i32 = arith.constant 0 : i32
    %c0_i32_0 = arith.constant 0 : i32
    %c0_i32_1 = arith.constant 0 : i32
    return %c0_i32, %c0_i32_0 : i32, i32
  }
  func.func @transform_2(%arg0: i32) -> (i32, i32) {
    %c0_i32 = arith.constant 0 : i32
    %c0_i32_0 = arith.constant 0 : i32
    %c0_i32_1 = arith.constant 0 : i32
    return %c0_i32, %c0_i32_0 : i32, i32
  }
  func.func @transform_3(%arg0: i32) -> (i32, i32) {
    %c0_i32 = arith.constant 0 : i32
    %c0_i32_0 = arith.constant 0 : i32
    return %arg0, %c0_i32 : i32, i32
  }
}

module attributes {stable_mosaic.version = 11 : i64} {
  func.func @_matmul_bias_relu_kernel(%arg0: i32, %arg1: memref<16x576xbf16, #tpu.memory_space<vmem>>, %arg2: memref<576x128xbf16, #tpu.memory_space<vmem>>, %arg3: memref<1x128xf32, #tpu.memory_space<vmem>>, %arg4: memref<16x128xf32, #tpu.memory_space<vmem>>) attributes {dimension_semantics = [#tpu.dimension_semantics<parallel>], iteration_bounds = array<i64: 1>, scalar_prefetch = 0 : i64, scratch_operands = 0 : i64, tpu.core_type = #tpu.core_type<tc>, window_params = [{transform_indices = @transform_0, window_bounds = array<i64: 16, 576>}, {pipeline_mode = #tpu.pipeline_mode<synchronous>, transform_indices = @transform_1, window_bounds = array<i64: 576, 128>}, {pipeline_mode = #tpu.pipeline_mode<synchronous>, transform_indices = @transform_2, window_bounds = array<i64: 1, 128>}, {transform_indices = @transform_3, window_bounds = array<i64: 16, 128>}]} {
    %c0 = arith.constant 0 : index
    %c0_0 = arith.constant 0 : index
    %0 = vector.load %arg1[%c0, %c0_0] : memref<16x576xbf16, #tpu.memory_space<vmem>>, vector<16x576xbf16>
    %c0_1 = arith.constant 0 : index
    %c0_2 = arith.constant 0 : index
    %1 = vector.load %arg2[%c0_1, %c0_2] : memref<576x128xbf16, #tpu.memory_space<vmem>>, vector<576x128xbf16>
    %cst = arith.constant dense<0.000000e+00> : vector<16x128xf32>
    %2 = tpu.matmul %0, %1, %cst {dimension_numbers = #tpu.dot_dimension_numbers<[1], [0], [0], [1], [0, 0, 1, 1], [], []>} : vector<16x576xbf16>, vector<576x128xbf16>, vector<16x128xf32> -> vector<16x128xf32>
    %c0_3 = arith.constant 0 : index
    %c0_4 = arith.constant 0 : index
    %3 = vector.load %arg3[%c0_3, %c0_4] : memref<1x128xf32, #tpu.memory_space<vmem>>, vector<1x128xf32>
    %4 = vector.broadcast %3 : vector<1x128xf32> to vector<16x128xf32>
    %5 = arith.addf %2, %4 : vector<16x128xf32>
    %cst_5 = arith.constant 0.000000e+00 : f32
    %6 = vector.broadcast %cst_5 : f32 to vector<16x128xf32>
    %7 = arith.maximumf %5, %6 : vector<16x128xf32>
    %c0_6 = arith.constant 0 : index
    %c0_7 = arith.constant 0 : index
    %8 = vector.load %arg4[%c0_6, %c0_7] : memref<16x128xf32, #tpu.memory_space<vmem>>, vector<16x128xf32>
    tpu.vector_store %arg4[%c0_6, %c0_7], %7 {strides = array<i32>} : memref<16x128xf32, #tpu.memory_space<vmem>>, vector<16x128xf32>,
    return
  }
  func.func @transform_0(%arg0: i32) -> (i32, i32) {
    %c0_i32 = arith.constant 0 : i32
    %c0_i32_0 = arith.constant 0 : i32
    return %arg0, %c0_i32 : i32, i32
  }
  func.func @transform_1(%arg0: i32) -> (i32, i32) {
    %c0_i32 = arith.constant 0 : i32
    %c0_i32_0 = arith.constant 0 : i32
    %c0_i32_1 = arith.constant 0 : i32
    return %c0_i32, %c0_i32_0 : i32, i32
  }
  func.func @transform_2(%arg0: i32) -> (i32, i32) {
    %c0_i32 = arith.constant 0 : i32
    %c0_i32_0 = arith.constant 0 : i32
    %c0_i32_1 = arith.constant 0 : i32
    return %c0_i32, %c0_i32_0 : i32, i32
  }
  func.func @transform_3(%arg0: i32) -> (i32, i32) {
    %c0_i32 = arith.constant 0 : i32
    %c0_i32_0 = arith.constant 0 : i32
    return %arg0, %c0_i32 : i32, i32
  }
}

</mosaic_0001>

<bundles_post_ra>
// kernel: _lambda_.3
= control target key start
LH: loop header
LB: loop body
LE: loop exit
PB: predicated region body
PF: predicated region fallthrough
CT: control target
= control target key end

     0   :  { %s717_s1 = inlined_call_operand.vmem [shape: bf16[256,128], index: 1, kind: input, shape index: {}]   ;;  %s718_s0 = inlined_call_operand.vmem [shape: bf16[128,256], index: 0, kind: input, shape index: {}]   ;;  %s719_s2 = inlined_call_operand.vmem [shape: f32[1,128], index: 2, kind: input, shape index: {}]   ;;  %s720_s3 = inlined_call_operand.vmem [shape: f32[128,128], index: 3, kind: output, shape index: {}]  }
   0x1   :  { %v492_v0 = vld [vmem:[%s717_s1 + $0x78] sm:$0xff]   ;;  %v494_v2 = vld [vmem:[%s717_s1 + $0x70] sm:$0xff]   ;;  %v496_v4 = vld [vmem:[%s717_s1 + $0x68] sm:$0xff]  }
   0x2   :  { %v493_v1 = vld [vmem:[%s717_s1 + $0x38] sm:$0xff]   ;;  %412 = vmatprep.subr.bf16.mxu0 %v492_v0  ;;  %476 = vmatprep.subr.bf16.mxu1 %v492_v0  ;;  %v495_v3 = vld [vmem:[%s717_s1 + $0x30] sm:$0xff]   ;;  %v497_v5 = vld [vmem:[%s717_s1 + $0x28] sm:$0xff]  }
   0x3   :  { %413 = vmatpush3.bf16.msra.mxu0 %v493_v1  ;;  %484 = vmatpush3.bf16.msra.mxu1 %v493_v1  ;;  %v498_v6 = vld [vmem:[%s717_s1 + $0x60] sm:$0xff]   ;;  %v500_v8 = vld [vmem:[%s717_s1 + $0x58] sm:$0xff]   ;;  %v502_v10 = vld [vmem:[%s717_s1 + $0x50] sm:$0xff]  }
   0x4   :  { %414 = vmatprep.subr.bf16.mxu0 %v494_v2  ;;  %477 = vmatprep.subr.bf16.mxu1 %v494_v2  ;;  %v499_v7 = vld [vmem:[%s717_s1 + $0x20] sm:$0xff]   ;;  %v501_v9 = vld [vmem:[%s717_s1 + $0x18] sm:$0xff]   ;;  %v503_v13 = vld [vmem:[%s717_s1 + $0x10] sm:$0xff]  }
   0x5   :  { %v510_v11 = vld [vmem:[%s718_s0 + $0x4] ss:$8 sps:$4 sm:$0xff]   ;;  %v508_v18 = vld [vmem:[%s718_s0] ss:$8 sps:$4 sm:$0xff]   ;;  %v514_v20 = vld [vmem:[%s718_s0 + $0x14] ss:$8 sps:$4 sm:$0xff]  }
   0x6   :  { %v513_v12 = vld [vmem:[%s718_s0 + $0x44] ss:$8 sps:$4 sm:$0xff]   ;;  %278 = vmatprep.mubr.bf16.mxu0 %v510_v11  ;;  %v511_v19 = vld [vmem:[%s718_s0 + $0x40] ss:$8 sps:$4 sm:$0xff]   ;;  %v516_v21 = vld [vmem:[%s718_s0 + $0x54] ss:$8 sps:$4 sm:$0xff]  }
   0x7   :  { %415 = vmatpush3.bf16.msra.mxu0 %v495_v3  ;;  %485 = vmatpush3.bf16.msra.mxu1 %v495_v3  ;;  %v504_v14 = vld [vmem:[%s717_s1 + $0x48] sm:$0xff]   ;;  %v506_v16 = vld [vmem:[%s717_s1 + $0x40] sm:$0xff]   ;;  %v518_v22 = vld [vmem:[%s718_s0 + $0x10] ss:$8 sps:$4 sm:$0xff]  }
   0x8   :  { %416 = vmatprep.subr.bf16.mxu0 %v496_v4  ;;  %478 = vmatprep.subr.bf16.mxu1 %v496_v4  ;;  %v505_v15 = vld [vmem:[%s717_s1 + $0x8] sm:$0xff]   ;;  %v507_v17 = vld [vmem:[%s717_s1] sm:$0xff]   ;;  %v519_v23 = vld [vmem:[%s718_s0 + $0x50] ss:$8 sps:$4 sm:$0xff]  }
   0x9   :  { %310 = vmatprep.mubr.bf16.mxu1 %v513_v12  ;;  %v520_v24 = vld [vmem:[%s718_s0 + $0x24] ss:$8 sps:$4 sm:$0xff]   ;;  %v524_v26 = vld [vmem:[%s718_s0 + $0x20] ss:$8 sps:$4 sm:$0xff]   ;;  %v526_v28 = vld [vmem:[%s718_s0 + $0x34] ss:$8 sps:$4 sm:$0xff]  }
   0xa   :  { %v522_v25 = vld [vmem:[%s718_s0 + $0x64] ss:$8 sps:$4 sm:$0xff]   ;;  %v525_v27 = vld [vmem:[%s718_s0 + $0x60] ss:$8 sps:$4 sm:$0xff]   ;;  %v528_v29 = vld [vmem:[%s718_s0 + $0x74] ss:$8 sps:$4 sm:$0xff]  }
   0xb   :  { %417 = vmatpush3.bf16.msra.mxu0 %v497_v5  ;;  %486 = vmatpush3.bf16.msra.mxu1 %v497_v5  ;;  %v530_v30 = vld [vmem:[%s718_s0 + $0x30] ss:$8 sps:$4 sm:$0xff]   ;;  %v651_v34 = vld [vmem:[%s719_s2] ss:$0 sm:$0xff] }
   0xc   :  { %418 = vmatprep.subr.bf16.mxu0 %v498_v6  ;;  %479 = vmatprep.subr.bf16.mxu1 %v498_v6  ;;  %v531_v31 = vld [vmem:[%s718_s0 + $0x70] ss:$8 sps:$4 sm:$0xff]  }
   0xf   :  { %419 = vmatpush3.bf16.msra.mxu0 %v499_v7  ;;  %487 = vmatpush3.bf16.msra.mxu1 %v499_v7 }
  0x10   :  { %420 = vmatprep.subr.bf16.mxu0 %v500_v8  ;;  %480 = vmatprep.subr.bf16.mxu1 %v500_v8 }
  0x13   :  { %421 = vmatpush3.bf16.msra.mxu0 %v501_v9  ;;  %488 = vmatpush3.bf16.msra.mxu1 %v501_v9 }
  0x14   :  { %422 = vmatprep.subr.bf16.mxu0 %v502_v10  ;;  %481 = vmatprep.subr.bf16.mxu1 %v502_v10 }
  0x17   :  { %423 = vmatpush3.bf16.msra.mxu0 %v503_v13  ;;  %489 = vmatpush3.bf16.msra.mxu1 %v503_v13 }
  0x18   :  { %424 = vmatprep.subr.bf16.mxu0 %v504_v14  ;;  %482 = vmatprep.subr.bf16.mxu1 %v504_v14 }
  0x1b   :  { %425 = vmatpush3.bf16.msra.mxu0 %v505_v15  ;;  %490 = vmatpush3.bf16.msra.mxu1 %v505_v15 }
  0x1c   :  { %426 = vmatprep.subr.bf16.mxu0 %v506_v16  ;;  %483 = vmatprep.subr.bf16.mxu1 %v506_v16 }
  0x1f   :  { %427 = vmatpush3.bf16.msra.mxu0 %v507_v17  ;;  %491 = vmatpush3.bf16.msra.mxu1 %v507_v17 }
  0x22   :  { %279 = vmatmul.mubr.bf16.vlgmr.msra.gmra.mxu0 %v508_v18  ;;  %311 = vmatmul.mubr.bf16.vlgmr.msra.gmra.mxu1 %v511_v19 }
  0x23   :  { %286 = vmatprep.mubr.bf16.mxu0 %v514_v20  ;;  %318 = vmatprep.mubr.bf16.mxu1 %v516_v21 }
  0x2a   :  { %287 = vmatmul.mubr.bf16.gmra.mxu0 %v518_v22  ;;  %319 = vmatmul.mubr.bf16.gmra.mxu1 %v519_v23 }
  0x2b   :  { %294 = vmatprep.mubr.bf16.mxu0 %v520_v24  ;;  %326 = vmatprep.mubr.bf16.mxu1 %v522_v25 }
  0x32   :  { %295 = vmatmul.mubr.bf16.gmra.mxu0 %v524_v26  ;;  %327 = vmatmul.mubr.bf16.gmra.mxu1 %v525_v27 }
  0x33   :  { %302 = vmatprep.mubr.bf16.mxu0 %v526_v28  ;;  %334 = vmatprep.mubr.bf16.mxu1 %v528_v29 }
  0x3a   :  { %303 = vmatmul.mubr.bf16.gmra.mxu0 %v530_v30  ;;  %335 = vmatmul.mubr.bf16.gmra.mxu1 %v531_v31 }
  0xe2   :  { %v428_v32 = vpop.f32.mrf.mxu0  ;;  %v452_v33 = vpop.f32.mrf.mxu1 }
  0xe4   :  { %v429_v35 = vpop.f32.mrf.mxu0  ;;  %v453_v36 = vpop.f32.mrf.mxu1 }
  0xe5   :  { %v430_v37 = vadd.f32 %v429_v35, %v428_v32  ;;  %v454_v38 = vadd.f32 %v453_v36, %v452_v33 }
  0xe6   :  { %v431_v39 = vpop.f32.mrf.mxu0  ;;  %v455_v40 = vpop.f32.mrf.mxu1 }
  0xe7   :  { %v281_v41 = vadd.f32 %v430_v37, %v651_v34  ;;  %v313_v42 = vadd.f32 %v454_v38, %v651_v34 }
  0xe8   :  { %v432_v43 = vpop.f32.mrf.mxu0  ;;  %v456_v44 = vpop.f32.mrf.mxu1 }
  0xe9   :  { %v343_v45 = vmax.f32 %v281_v41, 0.0  ;;  %v351_v46 = vmax.f32 %v313_v42, 0.0  ;;  %v433_v47 = vadd.f32 %v432_v43, %v431_v39  ;;  %v457_v48 = vadd.f32 %v456_v44, %v455_v40 }
  0xea   :  { %v434_v49 = vpop.f32.mrf.mxu0  ;;  %v458_v50 = vpop.f32.mrf.mxu1 }
  0xeb   :  { %359 = vst [vmem:[%s720_s3] sm:$0xff] %v343_v45  ;;  %367 = vst [vmem:[%s720_s3 + $0x40] sm:$0xff] %v351_v46  ;;  %v284_v51 = vadd.f32 %v433_v47, %v651_v34  ;;  %v316_v52 = vadd.f32 %v457_v48, %v651_v34 }
  0xec   :  { %v435_v53 = vpop.f32.mrf.mxu0  ;;  %v459_v54 = vpop.f32.mrf.mxu1 }
  0xed   :  { %v344_v55 = vmax.f32 %v284_v51, 0.0  ;;  %v352_v56 = vmax.f32 %v316_v52, 0.0  ;;  %v436_v57 = vadd.f32 %v435_v53, %v434_v49  ;;  %v460_v58 = vadd.f32 %v459_v54, %v458_v50 }
  0xee   :  { %v437_v59 = vpop.f32.mrf.mxu0  ;;  %v461_v60 = vpop.f32.mrf.mxu1 }
  0xef   :  { %360 = vst [vmem:[%s720_s3 + $0x8] sm:$0xff] %v344_v55  ;;  %368 = vst [vmem:[%s720_s3 + $0x48] sm:$0xff] %v352_v56  ;;  %v289_v61 = vadd.f32 %v436_v57, %v651_v34  ;;  %v321_v62 = vadd.f32 %v460_v58, %v651_v34 }
  0xf0   :  { %v438_v63 = vpop.f32.mrf.mxu0  ;;  %v462_v0 = vpop.f32.mrf.mxu1 }
  0xf1   :  { %v345_v1 = vmax.f32 %v289_v61, 0.0  ;;  %v353_v2 = vmax.f32 %v321_v62, 0.0  ;;  %v439_v3 = vadd.f32 %v438_v63, %v437_v59  ;;  %v463_v4 = vadd.f32 %v462_v0, %v461_v60 }
  0xf2   :  { %v440_v5 = vpop.f32.mrf.mxu0  ;;  %v464_v6 = vpop.f32.mrf.mxu1 }
  0xf3   :  { %361 = vst [vmem:[%s720_s3 + $0x10] sm:$0xff] %v345_v1  ;;  %369 = vst [vmem:[%s720_s3 + $0x50] sm:$0xff] %v353_v2  ;;  %v292_v7 = vadd.f32 %v439_v3, %v651_v34  ;;  %v324_v8 = vadd.f32 %v463_v4, %v651_v34 }
  0xf4   :  { %v441_v9 = vpop.f32.mrf.mxu0  ;;  %v465_v10 = vpop.f32.mrf.mxu1 }
  0xf5   :  { %v346_v11 = vmax.f32 %v292_v7, 0.0  ;;  %v354_v12 = vmax.f32 %v324_v8, 0.0  ;;  %v442_v13 = vadd.f32 %v441_v9, %v440_v5  ;;  %v466_v14 = vadd.f32 %v465_v10, %v464_v6 }
  0xf6   :  { %v443_v15 = vpop.f32.mrf.mxu0  ;;  %v467_v16 = vpop.f32.mrf.mxu1 }
  0xf7   :  { %362 = vst [vmem:[%s720_s3 + $0x18] sm:$0xff] %v346_v11  ;;  %370 = vst [vmem:[%s720_s3 + $0x58] sm:$0xff] %v354_v12  ;;  %v297_v17 = vadd.f32 %v442_v13, %v651_v34  ;;  %v329_v18 = vadd.f32 %v466_v14, %v651_v34 }
  0xf8   :  { %v444_v19 = vpop.f32.mrf.mxu0  ;;  %v468_v20 = vpop.f32.mrf.mxu1 }
  0xf9   :  { %v347_v21 = vmax.f32 %v297_v17, 0.0  ;;  %v355_v22 = vmax.f32 %v329_v18, 0.0  ;;  %v445_v23 = vadd.f32 %v444_v19, %v443_v15  ;;  %v469_v24 = vadd.f32 %v468_v20, %v467_v16 }
  0xfa   :  { %v446_v25 = vpop.f32.mrf.mxu0  ;;  %v470_v26 = vpop.f32.mrf.mxu1 }
  0xfb   :  { %363 = vst [vmem:[%s720_s3 + $0x20] sm:$0xff] %v347_v21  ;;  %371 = vst [vmem:[%s720_s3 + $0x60] sm:$0xff] %v355_v22  ;;  %v300_v27 = vadd.f32 %v445_v23, %v651_v34  ;;  %v332_v28 = vadd.f32 %v469_v24, %v651_v34 }
  0xfc   :  { %v447_v29 = vpop.f32.mrf.mxu0  ;;  %v471_v30 = vpop.f32.mrf.mxu1 }
  0xfd   :  { %v348_v31 = vmax.f32 %v300_v27, 0.0  ;;  %v356_v32 = vmax.f32 %v332_v28, 0.0  ;;  %v448_v33 = vadd.f32 %v447_v29, %v446_v25  ;;  %v472_v35 = vadd.f32 %v471_v30, %v470_v26 }
  0xfe   :  { %v449_v36 = vpop.f32.mrf.mxu0  ;;  %v473_v37 = vpop.f32.mrf.mxu1 }
  0xff   :  { %364 = vst [vmem:[%s720_s3 + $0x28] sm:$0xff] %v348_v31  ;;  %372 = vst [vmem:[%s720_s3 + $0x68] sm:$0xff] %v356_v32  ;;  %v305_v38 = vadd.f32 %v448_v33, %v651_v34  ;;  %v337_v39 = vadd.f32 %v472_v35, %v651_v34 }
 0x100   :  { %v450_v40 = vpop.f32.mrf.mxu0  ;;  %v474_v41 = vpop.f32.mrf.mxu1 }
 0x101   :  { %v349_v42 = vmax.f32 %v305_v38, 0.0  ;;  %v357_v43 = vmax.f32 %v337_v39, 0.0  ;;  %v451_v44 = vadd.f32 %v450_v40, %v449_v36  ;;  %v475_v45 = vadd.f32 %v474_v41, %v473_v37 }
 0x103   :  { %365 = vst [vmem:[%s720_s3 + $0x30] sm:$0xff] %v349_v42  ;;  %373 = vst [vmem:[%s720_s3 + $0x70] sm:$0xff] %v357_v43  ;;  %v308_v46 = vadd.f32 %v451_v44, %v651_v34  ;;  %v340_v47 = vadd.f32 %v475_v45, %v651_v34 }
 0x105   :  { %v350_v48 = vmax.f32 %v308_v46, 0.0  ;;  %v358_v49 = vmax.f32 %v340_v47, 0.0 }
 0x107   :  { %366 = vst [vmem:[%s720_s3 + $0x38] sm:$0xff] %v350_v48  ;;  %374 = vst [vmem:[%s720_s3 + $0x78] sm:$0xff] %v358_v49 }

// kernel: _lambda_.4
= control target key start
LH: loop header
LB: loop body
LE: loop exit
PB: predicated region body
PF: predicated region fallthrough
CT: control target
= control target key end

     0   :  { %s732_s1 = inlined_call_operand.vmem [shape: bf16[512,128], index: 1, kind: input, shape index: {}]   ;;  %s733_s0 = inlined_call_operand.vmem [shape: bf16[32,512], index: 0, kind: input, shape index: {}]   ;;  %s734_s2 = inlined_call_operand.vmem [shape: f32[1,128], index: 2, kind: input, shape index: {}]   ;;  %s735_s3 = inlined_call_operand.vmem [shape: f32[32,128], index: 3, kind: output, shape index: {}]  }
   0x1   :  { %v533_v0 = vld [vmem:[%s732_s1 + $0x78] sm:$0xff]   ;;  %v537_v4 = vld [vmem:[%s732_s1 + $0x70] sm:$0xff]   ;;  %v541_v8 = vld [vmem:[%s732_s1 + $0x68] sm:$0xff]  }
   0x2   :  { %v534_v1 = vld [vmem:[%s732_s1 + $0xf8] sm:$0xff]   ;;  %477 = vmatprep.subr.bf16.mxu0 %v533_v0  ;;  %v538_v5 = vld [vmem:[%s732_s1 + $0xf0] sm:$0xff]   ;;  %v542_v9 = vld [vmem:[%s732_s1 + $0xe8] sm:$0xff]  }
   0x3   :  { %v535_v2 = vld [vmem:[%s732_s1 + $0x38] sm:$0xff]   ;;  %505 = vmatprep.subr.bf16.mxu1 %v534_v1  ;;  %v539_v6 = vld [vmem:[%s732_s1 + $0x30] sm:$0xff]   ;;  %v543_v10 = vld [vmem:[%s732_s1 + $0x28] sm:$0xff]  }
   0x4   :  { %v536_v3 = vld [vmem:[%s732_s1 + $0xb8] sm:$0xff]   ;;  %478 = vmatpush3.bf16.msra.mxu0 %v535_v2  ;;  %v540_v7 = vld [vmem:[%s732_s1 + $0xb0] sm:$0xff]   ;;  %v544_v11 = vld [vmem:[%s732_s1 + $0xa8] sm:$0xff]  }
   0x5   :  { %506 = vmatpush3.bf16.msra.mxu1 %v536_v3  ;;  %479 = vmatprep.subr.bf16.mxu0 %v537_v4  ;;  %v545_v12 = vld [vmem:[%s732_s1 + $0x60] sm:$0xff]   ;;  %v549_v16 = vld [vmem:[%s732_s1 + $0x58] sm:$0xff]   ;;  %v553_v20 = vld [vmem:[%s732_s1 + $0x50] sm:$0xff]  }
   0x6   :  { %507 = vmatprep.subr.bf16.mxu1 %v538_v5  ;;  %v546_v13 = vld [vmem:[%s732_s1 + $0xe0] sm:$0xff]   ;;  %v550_v17 = vld [vmem:[%s732_s1 + $0xd8] sm:$0xff]   ;;  %v554_v21 = vld [vmem:[%s732_s1 + $0xd0] sm:$0xff]  }
   0x7   :  { %v547_v14 = vld [vmem:[%s732_s1 + $0x20] sm:$0xff]   ;;  %v551_v18 = vld [vmem:[%s732_s1 + $0x18] sm:$0xff]   ;;  %v555_v22 = vld [vmem:[%s732_s1 + $0x10] sm:$0xff]  }
   0x8   :  { %480 = vmatpush3.bf16.msra.mxu0 %v539_v6  ;;  %v548_v15 = vld [vmem:[%s732_s1 + $0xa0] sm:$0xff]   ;;  %v552_v19 = vld [vmem:[%s732_s1 + $0x98] sm:$0xff]   ;;  %v556_v23 = vld [vmem:[%s732_s1 + $0x90] sm:$0xff]  }
   0x9   :  { %508 = vmatpush3.bf16.msra.mxu1 %v540_v7  ;;  %481 = vmatprep.subr.bf16.mxu0 %v541_v8  ;;  %v557_v24 = vld [vmem:[%s732_s1 + $0x48] sm:$0xff]   ;;  %v561_v28 = vld [vmem:[%s732_s1 + $0x40] sm:$0xff]  }
   0xa   :  { %509 = vmatprep.subr.bf16.mxu1 %v542_v9  ;;  %v558_v25 = vld [vmem:[%s732_s1 + $0xc8] sm:$0xff]   ;;  %v562_v29 = vld [vmem:[%s732_s1 + $0xc0] sm:$0xff]  }
   0xb   :  { %v559_v26 = vld [vmem:[%s732_s1 + $0x8] sm:$0xff]   ;;  %v563_v30 = vld [vmem:[%s732_s1] sm:$0xff]  }
   0xc   :  { %482 = vmatpush3.bf16.msra.mxu0 %v543_v10  ;;  %v560_v27 = vld [vmem:[%s732_s1 + $0x88] sm:$0xff]   ;;  %v564_v31 = vld [vmem:[%s732_s1 + $0x80] sm:$0xff]  }
   0xd   :  { %510 = vmatpush3.bf16.msra.mxu1 %v544_v11  ;;  %483 = vmatprep.subr.bf16.mxu0 %v545_v12  ;;  %v565_v32 = vld [vmem:[%s733_s0] ss:$16 sps:$4 sm:$0xff]   ;;  %v567_v33 = vld [vmem:[%s733_s0 + $0x4] ss:$16 sps:$4 sm:$0xff]   ;;  %v568_v34 = vld [vmem:[%s733_s0 + $0x8] ss:$16 sps:$4 sm:$0xff]  }
   0xe   :  { %511 = vmatprep.subr.bf16.mxu1 %v546_v13  ;;  %v570_v35 = vld [vmem:[%s733_s0 + $0xc] ss:$16 sps:$4 sm:$0xff]   ;;  %358 = vmatprep.mubr.bf16.mxu0 %v567_v33  ;;  %v571_v36 = vld [vmem:[%s733_s0 + $0x24] ss:$16 sps:$4 sm:$0xff]   ;;  %v575_v38 = vld [vmem:[%s733_s0 + $0x20] ss:$16 sps:$4 sm:$0xff]  }
   0xf   :  { %407 = vmatprep.mubr.bf16.mxu1 %v570_v35  ;;  %v573_v37 = vld [vmem:[%s733_s0 + $0x2c] ss:$16 sps:$4 sm:$0xff]   ;;  %v576_v39 = vld [vmem:[%s733_s0 + $0x28] ss:$16 sps:$4 sm:$0xff]   ;;  %v436_v42 = vld [vmem:[%s734_s2] ss:$0 sm:$0xff] }
  0x10   :  { %484 = vmatpush3.bf16.msra.mxu0 %v547_v14 }
  0x11   :  { %512 = vmatpush3.bf16.msra.mxu1 %v548_v15  ;;  %485 = vmatprep.subr.bf16.mxu0 %v549_v16 }
  0x12   :  { %513 = vmatprep.subr.bf16.mxu1 %v550_v17 }
  0x14   :  { %486 = vmatpush3.bf16.msra.mxu0 %v551_v18 }
  0x15   :  { %514 = vmatpush3.bf16.msra.mxu1 %v552_v19  ;;  %487 = vmatprep.subr.bf16.mxu0 %v553_v20 }
  0x16   :  { %515 = vmatprep.subr.bf16.mxu1 %v554_v21 }
  0x18   :  { %488 = vmatpush3.bf16.msra.mxu0 %v555_v22 }
  0x19   :  { %516 = vmatpush3.bf16.msra.mxu1 %v556_v23  ;;  %489 = vmatprep.subr.bf16.mxu0 %v557_v24 }
  0x1a   :  { %517 = vmatprep.subr.bf16.mxu1 %v558_v25 }
  0x1c   :  { %490 = vmatpush3.bf16.msra.mxu0 %v559_v26 }
  0x1d   :  { %518 = vmatpush3.bf16.msra.mxu1 %v560_v27  ;;  %491 = vmatprep.subr.bf16.mxu0 %v561_v28 }
  0x1e   :  { %519 = vmatprep.subr.bf16.mxu1 %v562_v29 }
  0x20   :  { %492 = vmatpush3.bf16.msra.mxu0 %v563_v30 }
  0x21   :  { %520 = vmatpush3.bf16.msra.mxu1 %v564_v31 }
  0x23   :  { %359 = vmatmul.mubr.bf16.vlgmr.msra.gmra.mxu0 %v565_v32 }
  0x24   :  { %408 = vmatmul.mubr.bf16.vlgmr.msra.gmra.mxu1 %v568_v34  ;;  %366 = vmatprep.mubr.bf16.mxu0 %v571_v36 }
  0x25   :  { %415 = vmatprep.mubr.bf16.mxu1 %v573_v37 }
  0x2b   :  { %367 = vmatmul.mubr.bf16.gmra.mxu0 %v575_v38 }
  0x2c   :  { %416 = vmatmul.mubr.bf16.gmra.mxu1 %v576_v39 }
  0xe3   :  { %v493_v40 = vpop.f32.mrf.mxu0 }
  0xe4   :  { %v521_v41 = vpop.f32.mrf.mxu1 }
  0xe5   :  { %v494_v43 = vpop.f32.mrf.mxu0 }
  0xe6   :  { %v495_v44 = vadd.f32 %v494_v43, %v493_v40  ;;  %v522_v45 = vpop.f32.mrf.mxu1 }
  0xe7   :  { %v496_v46 = vpop.f32.mrf.mxu0  ;;  %v523_v48 = vadd.f32 %v522_v45, %v521_v41 }
  0xe8   :  { %v361_v47 = vadd.f32 %v495_v44, %v436_v42  ;;  %v524_v49 = vpop.f32.mrf.mxu1 }
  0xe9   :  { %v497_v50 = vpop.f32.mrf.mxu0 }
  0xea   :  { %v410_v51 = vadd.f32 %v523_v48, %v361_v47  ;;  %v498_v52 = vadd.f32 %v497_v50, %v496_v46  ;;  %v525_v53 = vpop.f32.mrf.mxu1 }
  0xeb   :  { %v499_v54 = vpop.f32.mrf.mxu0  ;;  %v526_v57 = vadd.f32 %v525_v53, %v524_v49 }
  0xec   :  { %v424_v55 = vmax.f32 %v410_v51, 0.0  ;;  %v364_v56 = vadd.f32 %v498_v52, %v436_v42  ;;  %v527_v58 = vpop.f32.mrf.mxu1 }
  0xed   :  { %v500_v59 = vpop.f32.mrf.mxu0 }
  0xee   :  { %428 = vst [vmem:[%s735_s3] sm:$0xff] %v424_v55  ;;  %v413_v60 = vadd.f32 %v526_v57, %v364_v56  ;;  %v501_v61 = vadd.f32 %v500_v59, %v499_v54  ;;  %v528_v62 = vpop.f32.mrf.mxu1 }
  0xef   :  { %v502_v63 = vpop.f32.mrf.mxu0  ;;  %v529_v2 = vadd.f32 %v528_v62, %v527_v58 }
  0xf0   :  { %v425_v0 = vmax.f32 %v413_v60, 0.0  ;;  %v369_v1 = vadd.f32 %v501_v61, %v436_v42  ;;  %v530_v3 = vpop.f32.mrf.mxu1 }
  0xf1   :  { %v503_v4 = vpop.f32.mrf.mxu0 }
  0xf2   :  { %429 = vst [vmem:[%s735_s3 + $0x8] sm:$0xff] %v425_v0  ;;  %v418_v5 = vadd.f32 %v529_v2, %v369_v1  ;;  %v504_v6 = vadd.f32 %v503_v4, %v502_v63  ;;  %v531_v7 = vpop.f32.mrf.mxu1 }
  0xf3   :  { %v532_v10 = vadd.f32 %v531_v7, %v530_v3 }
  0xf4   :  { %v426_v8 = vmax.f32 %v418_v5, 0.0  ;;  %v372_v9 = vadd.f32 %v504_v6, %v436_v42 }
  0xf6   :  { %430 = vst [vmem:[%s735_s3 + $0x10] sm:$0xff] %v426_v8  ;;  %v421_v11 = vadd.f32 %v532_v10, %v372_v9 }
  0xf8   :  { %v427_v12 = vmax.f32 %v421_v11, 0.0 }
  0xfa   :  { %431 = vst [vmem:[%s735_s3 + $0x18] sm:$0xff] %v427_v12 }

// kernel: _lambda_.5
= control target key start
LH: loop header
LB: loop body
LE: loop exit
PB: predicated region body
PF: predicated region fallthrough
CT: control target
= control target key end

     0   :  { %v625_v33 = vmov 0.0   ;;  %vm626_vm0 = vmmov 0   ;;  %vm341_vm1 = vcmask 523264   ;;  %s779_s1 = inlined_call_operand.vmem [shape: bf16[576,128], index: 1, kind: input, shape index: {}]   ;;  %s780_s0 = inlined_call_operand.vmem [shape: bf16[16,576], index: 0, kind: input, shape index: {}]   ;;  %s781_s2 = inlined_call_operand.vmem [shape: f32[1,128], index: 2, kind: input, shape index: {}]   ;;  %s782_s3 = inlined_call_operand.vmem [shape: f32[16,128], index: 3, kind: output, shape index: {}]  }
   0x1   :  { %v582_v0 = vld [vmem:[%s779_s1 + $0x78] sm:$0xff]   ;;  %v586_v4 = vld [vmem:[%s779_s1 + $0x70] sm:$0xff]   ;;  %v590_v8 = vld [vmem:[%s779_s1 + $0x68] sm:$0xff]  }
   0x2   :  { %v583_v1 = vld [vmem:[%s779_s1 + $0x38] sm:$0xff]   ;;  %519 = vmatprep.subr.bf16.mxu0 %v582_v0  ;;  %v587_v5 = vld [vmem:[%s779_s1 + $0x30] sm:$0xff]   ;;  %v591_v9 = vld [vmem:[%s779_s1 + $0x28] sm:$0xff]  }
   0x3   :  { %v584_v2 = vld [vmem:[%s779_s1 + $0xf8] sm:$0xff]   ;;  %520 = vmatpush3.bf16.msra.mxu0 %v583_v1  ;;  %v588_v6 = vld [vmem:[%s779_s1 + $0xf0] sm:$0xff]   ;;  %v592_v10 = vld [vmem:[%s779_s1 + $0xe8] sm:$0xff]  }
   0x4   :  { %v585_v3 = vld [vmem:[%s779_s1 + $0xb8] sm:$0xff]   ;;  %541 = vmatprep.subr.bf16.mxu1 %v584_v2  ;;  %521 = vmatprep.subr.bf16.mxu0 %v586_v4  ;;  %v589_v7 = vld [vmem:[%s779_s1 + $0xb0] sm:$0xff]   ;;  %v593_v11 = vld [vmem:[%s779_s1 + $0xa8] sm:$0xff]  }
   0x5   :  { %542 = vmatpush3.bf16.msra.mxu1 %v585_v3  ;;  %v594_v12 = vld [vmem:[%s779_s1 + $0x60] sm:$0xff]   ;;  %v598_v16 = vld [vmem:[%s779_s1 + $0x58] sm:$0xff]   ;;  %v602_v20 = vld [vmem:[%s779_s1 + $0x50] sm:$0xff]  }
   0x6   :  { %543 = vmatprep.subr.bf16.mxu1 %v588_v6  ;;  %v595_v13 = vld [vmem:[%s779_s1 + $0x20] sm:$0xff]   ;;  %v599_v17 = vld [vmem:[%s779_s1 + $0x18] sm:$0xff]   ;;  %v603_v21 = vld [vmem:[%s779_s1 + $0x10] sm:$0xff]  }
   0x7   :  { %522 = vmatpush3.bf16.msra.mxu0 %v587_v5  ;;  %v596_v14 = vld [vmem:[%s779_s1 + $0xe0] sm:$0xff]   ;;  %v600_v18 = vld [vmem:[%s779_s1 + $0xd8] sm:$0xff]   ;;  %v604_v22 = vld [vmem:[%s779_s1 + $0xd0] sm:$0xff]  }
   0x8   :  { %523 = vmatprep.subr.bf16.mxu0 %v590_v8  ;;  %v597_v15 = vld [vmem:[%s779_s1 + $0xa0] sm:$0xff]   ;;  %v601_v19 = vld [vmem:[%s779_s1 + $0x98] sm:$0xff]   ;;  %v605_v23 = vld [vmem:[%s779_s1 + $0x90] sm:$0xff]  }
   0x9   :  { %544 = vmatpush3.bf16.msra.mxu1 %v589_v7  ;;  %v606_v24 = vld [vmem:[%s779_s1 + $0x48] sm:$0xff]   ;;  %v610_v28 = vld [vmem:[%s779_s1 + $0x40] sm:$0xff]   ;;  %v620_v37 = vld [vmem:[%s779_s1 + $0x118] sm:$0xff]  }
   0xa   :  { %545 = vmatprep.subr.bf16.mxu1 %v592_v10  ;;  %v607_v25 = vld [vmem:[%s779_s1 + $0x8] sm:$0xff]   ;;  %v611_v29 = vld [vmem:[%s779_s1] sm:$0xff]   ;;  %v621_v38 = vld [vmem:[%s779_s1 + $0x110] sm:$0xff]  }
   0xb   :  { %524 = vmatpush3.bf16.msra.mxu0 %v591_v9  ;;  %v608_v26 = vld [vmem:[%s779_s1 + $0xc8] sm:$0xff]   ;;  %v612_v30 = vld [vmem:[%s779_s1 + $0xc0] sm:$0xff]  }
   0xc   :  { %525 = vmatprep.subr.bf16.mxu0 %v594_v12  ;;  %v609_v27 = vld [vmem:[%s779_s1 + $0x88] sm:$0xff]   ;;  %v613_v31 = vld [vmem:[%s780_s0] ss:$20 sps:$4 sm:$0xff]   ;;  %v615_v32 = vld [vmem:[%s780_s0 + $0x4] ss:$20 sps:$4 sm:$0xff]  }
   0xd   :  { %546 = vmatpush3.bf16.msra.mxu1 %v593_v11  ;;  %v616_v34 = vld [vmem:[%s779_s1 + $0x80] sm:$0xff]   ;;  %377 = vmatprep.mubr.bf16.mxu0 %v615_v32  ;;  %v617_v35 = vld [vmem:[%s780_s0 + $0x8] ss:$20 sps:$4 sm:$0xff]  }
   0xe   :  { %547 = vmatprep.subr.bf16.mxu1 %v596_v14  ;;  %v619_v36 = vld [vmem:[%s780_s0 + $0xc] ss:$20 sps:$4 sm:$0xff]   ;;  %v624_v41 = vld [vmem:[%s780_s0 + $0x10] ss:$20 sps:$4 sm:$0xff]  }
   0xf   :  { %526 = vmatpush3.bf16.msra.mxu0 %v595_v13  ;;  %418 = vmatprep.mubr.bf16.mxu1 %v619_v36  ;;  %v622_v39 = vld [vmem:[%s779_s1 + $0x108] sm:$0xff]   ;;  %v623_v40 = vld [vmem:[%s779_s1 + $0x100] sm:$0xff]  }
  0x10   :  { %527 = vmatprep.subr.bf16.mxu0 %v598_v16  ;;  %v476_v48 = vld [vmem:[%s781_s2] ss:$0 sm:$0xff] }
  0x11   :  { %548 = vmatpush3.bf16.msra.mxu1 %v597_v15 }
  0x12   :  { %549 = vmatprep.subr.bf16.mxu1 %v600_v18 }
  0x13   :  { %528 = vmatpush3.bf16.msra.mxu0 %v599_v17 }
  0x14   :  { %529 = vmatprep.subr.bf16.mxu0 %v602_v20 }
  0x15   :  { %550 = vmatpush3.bf16.msra.mxu1 %v601_v19 }
  0x16   :  { %551 = vmatprep.subr.bf16.mxu1 %v604_v22 }
  0x17   :  { %530 = vmatpush3.bf16.msra.mxu0 %v603_v21 }
  0x18   :  { %531 = vmatprep.subr.bf16.mxu0 %v606_v24 }
  0x19   :  { %552 = vmatpush3.bf16.msra.mxu1 %v605_v23 }
  0x1a   :  { %553 = vmatprep.subr.bf16.mxu1 %v608_v26 }
  0x1b   :  { %532 = vmatpush3.bf16.msra.mxu0 %v607_v25 }
  0x1c   :  { %533 = vmatprep.subr.bf16.mxu0 %v610_v28 }
  0x1d   :  { %554 = vmatpush3.bf16.msra.mxu1 %v609_v27 }
  0x1e   :  { %555 = vmatprep.subr.bf16.mxu1 %v612_v30 }
  0x1f   :  { %534 = vmatpush3.bf16.msra.mxu0 %v611_v29 }
  0x20   :  { %568 = vmatprep.subr.bf16.mxu0 %v625_v33 }
  0x21   :  { %556 = vmatpush3.bf16.msra.mxu1 %v616_v34 }
  0x22   :  { %378 = vmatmul.mubr.bf16.vlgmr.msra.gmra.mxu0 %v613_v31 }
  0x23   :  { %576 = vmatprep.mubr.msk.bf16.mxu0 %vm626_vm0, %v625_v33  ;;  %569 = vmatpush3.bf16.msra.mxu0 %v620_v37 }
  0x24   :  { %419 = vmatmul.mubr.bf16.vlgmr.msra.gmra.mxu1 %v617_v35  ;;  %570 = vmatprep.subr.bf16.mxu0 %v625_v33 }
  0x27   :  { %571 = vmatpush3.bf16.msra.mxu0 %v621_v38 }
  0x28   :  { %572 = vmatprep.subr.bf16.mxu0 %v625_v33 }
  0x2b   :  { %573 = vmatpush3.bf16.msra.mxu0 %v622_v39 }
  0x2c   :  { %574 = vmatprep.subr.bf16.mxu0 %v625_v33 }
  0x2f   :  { %575 = vmatpush3.bf16.msra.mxu0 %v623_v40 }
  0x32   :  { %577 = vmatmul.mubr.msk.bf16.vlgmr.msra.gmra.mxu0 %vm341_vm1, %v624_v41 }
  0xe2   :  { %v535_v42 = vpop.f32.mrf.mxu0 }
  0xe4   :  { %v536_v43 = vpop.f32.mrf.mxu0  ;;  %v557_v44 = vpop.f32.mrf.mxu1 }
  0xe5   :  { %v537_v47 = vadd.f32 %v536_v43, %v535_v42 }
  0xe6   :  { %v538_v45 = vpop.f32.mrf.mxu0  ;;  %v558_v46 = vpop.f32.mrf.mxu1 }
  0xe7   :  { %v380_v51 = vadd.f32 %v537_v47, %v476_v48  ;;  %v559_v52 = vadd.f32 %v558_v46, %v557_v44 }
  0xe8   :  { %v539_v49 = vpop.f32.mrf.mxu0  ;;  %v560_v50 = vpop.f32.mrf.mxu1 }
  0xe9   :  { %v540_v53 = vadd.f32 %v539_v49, %v538_v45  ;;  %v421_v57 = vadd.f32 %v559_v52, %v380_v51 }
  0xea   :  { %v561_v54 = vpop.f32.mrf.mxu1 }
  0xeb   :  { %v383_v55 = vadd.f32 %v540_v53, %v476_v48  ;;  %v562_v56 = vadd.f32 %v561_v54, %v560_v50 }
  0xed   :  { %v424_v62 = vadd.f32 %v562_v56, %v383_v55 }
  0xf2   :  { %v461_v58 = vpop.f32.mrf.mxu0 }
  0xf3   :  { %v462_v59 = vadd.f32 %v461_v58, %v421_v57 }
  0xf4   :  { %v578_v60 = vpop.f32.mrf.mxu0 }
  0xf5   :  { %v468_v61 = vmax.f32 %v462_v59, 0.0 }
  0xf6   :  { %v464_v63 = vpop.f32.mrf.mxu0 }
  0xf7   :  { %470 = vst [vmem:[%s782_s3] sm:$0xff] %v468_v61  ;;  %v465_v0 = vadd.f32 %v464_v63, %v424_v62 }
  0xf8   :  { %v579_v1 = vpop.f32.mrf.mxu0 }
  0xf9   :  { %v469_v2 = vmax.f32 %v465_v0, 0.0 }
  0xfb   :  { %471 = vst [vmem:[%s782_s3 + $0x8] sm:$0xff] %v469_v2 }

</bundles_post_ra>
